<compile_context>
chip_gen: v6e
topology: v6e:2x2x1
jax: 0.10.0
libtpu: 0.0.40
codegen_flags: <defaults>
</compile_context>

<pallas_src>
import functools

import jax
import jax.numpy as jnp
from jax.experimental import pallas as pl
from jax.experimental.pallas import tpu as pltpu


# ---------------------------------------------------------------------------
# Kernel
# ---------------------------------------------------------------------------
def prenorm_kernel(x_ref, w_ref, b_ref, o_ref, *, eps, unroll_conv):
    # x_ref: (1, C, TILE_P)  channels-on-sublanes, pixels-on-lanes tile
    # w_ref: (C_out, C_in)   f32, LayerNorm scale g already folded in
    # b_ref: (C_out, 1)      f32 conv bias
    # o_ref: (1, C_out, TILE_P)
    x = x_ref[0].astype(jnp.float32)                        # (C, P)
    c = x.shape[0]
    inv_c = jnp.float32(1.0 / c)

    # Fused single-pass LayerNorm statistics over the channel (sublane) axis.
    # var(unbiased=False) = E[x^2] - mean^2.
    s1 = jnp.sum(x, axis=0, keepdims=True)                  # (1, P)
    s2 = jnp.sum(x * x, axis=0, keepdims=True)              # (1, P)
    mean = s1 * inv_c
    var = s2 * inv_c - mean * mean
    normed = (x - mean) * jax.lax.rsqrt(var + eps)          # (C, P), f32

    if unroll_conv:
        # Small C: unrolled per-channel VPU multiply-adds; the MXU would be
        # >99% idle on a (C,C)x(C,P) matmul with C <= 8.
        w = w_ref[...]                                      # (C_out, C_in) f32
        acc = b_ref[...] + jnp.zeros_like(normed[:1, :])    # (C_out, P)
        for cc in range(c):
            acc = acc + w[:, cc:cc + 1] * normed[cc:cc + 1, :]
        out = acc
    else:
        # Large C: per-pixel channel matmul on the MXU, f32 accumulation.
        out = jnp.dot(w_ref[...], normed,
                      preferred_element_type=jnp.float32) + b_ref[...]

    o_ref[0] = out.astype(o_ref.dtype)


# ---------------------------------------------------------------------------
# Tiling / VMEM sizing helpers
# ---------------------------------------------------------------------------
_MAX_X_BLOCK_BYTES = 8 * 2**20     # diminishing returns past ~2-8 MiB / block
_F32_TMP_ROWS = 5                  # live f32 (C, P) temporaries inside kernel


def _vmem_capacity_bytes():
    try:
        return int(pltpu.get_tpu_info().vmem_capacity_bytes)
    except Exception:
        return 64 * 2**20          # conservative fallback: v7x per-TC VMEM


def _choose_pixel_tile(hw, c, itemsize, n_batch, vmem_cap):
    """Byte-targeted pixel tile (multiple of 128, or full H*W when small)."""
    # Per-pixel-column VMEM cost:
    #   x block + out block, double buffered each:  2 * (c*itemsize) * 2
    #   in-kernel f32 temporaries (upcast, normed, out, ...): ~_F32_TMP_ROWS*c*4
    per_px = c * (4 * itemsize + _F32_TMP_ROWS * 4)
    budget = vmem_cap // 2                                  # leave headroom
    tile = budget // per_px
    tile = min(tile, _MAX_X_BLOCK_BYTES // max(c * itemsize, 1))
    tile = max((tile // 128) * 128, 128)

    if tile >= hw:
        tile = hw                                           # one block, full dim
        # Keep >= 2 grid steps so both v7x TensorCores get work.
        if n_batch == 1 and hw >= 2 * 128:
            tile = -(-((hw + 1) // 2) // 128) * 128         # ~half, up to 128x
    return tile


# ---------------------------------------------------------------------------
# Wrapper
# ---------------------------------------------------------------------------
def prenorm_conv1x1(x_nchw, g, w, b):
    """x_nchw: (N, C, H, W); g: (1, C, 1, 1); w: (C_out, C_in); b: (C_out,)."""
    N, C, H, W = x_nchw.shape
    C_out, C_in = w.shape
    assert C_in == C and C_out == C, "fn is Conv2d(dim, dim, 1): C_out == C_in == dim"
    eps = 1e-5 if x_nchw.dtype == jnp.float32 else 1e-3
    HW = H * W
    itemsize = jnp.dtype(x_nchw.dtype).itemsize

    # NCHW -> (N, C, H*W) is a free reshape (no transpose / extra HBM pass).
    x_r = x_nchw.reshape(N, C, HW)

    # Fold LayerNorm scale g into the conv weight (trace-time constant fold):
    # w_g[o, c] = w[o, c] * g[c].  All-f32 compute (kernel is HBM-bound).
    w_g = (w * g.reshape(1, C)).astype(jnp.float32)          # (C_out, C_in)
    b_col = b.reshape(C_out, 1).astype(jnp.float32)          # (C_out, 1)

    vmem_cap = _vmem_capacity_bytes()
    tile_p = _choose_pixel_tile(HW, C, itemsize, N, vmem_cap)
    grid = (N, pl.cdiv(HW, tile_p))                          # ragged last block OK

    # VMEM budget: double-buffered x/out blocks + constants + f32 temporaries,
    # clamped to the physical per-core VMEM (v7x = 64 MiB).
    io_bytes = 2 * 2 * C * tile_p * itemsize                 # x + out, 2 bufs each
    const_bytes = C_out * C_in * 4 + C_out * 4               # weight + bias (f32)
    tmp_bytes = (_F32_TMP_ROWS + 1) * C * tile_p * 4         # in-kernel f32 temps
    vmem_limit = io_bytes + const_bytes + tmp_bytes + (4 << 20)
    vmem_limit = max(vmem_limit, 16 << 20)
    vmem_limit = min(vmem_limit, int(vmem_cap * 0.9))

    unroll_conv = C <= 8                                     # skip MXU for tiny C

    out_r = pl.pallas_call(
        functools.partial(prenorm_kernel, eps=eps, unroll_conv=unroll_conv),
        out_shape=jax.ShapeDtypeStruct((N, C_out, HW), x_nchw.dtype),
        grid_spec=pltpu.PrefetchScalarGridSpec(
            num_scalar_prefetch=0,
            grid=grid,
            in_specs=[
                pl.BlockSpec((1, C, tile_p), lambda n, p: (n, 0, p)),   # x tile
                pl.BlockSpec((C_out, C_in), lambda n, p: (0, 0)),       # folded weight
                pl.BlockSpec((C_out, 1), lambda n, p: (0, 0)),          # conv bias
            ],
            out_specs=pl.BlockSpec((1, C_out, tile_p), lambda n, p: (n, 0, p)),
        ),
        compiler_params=pltpu.CompilerParams(
            dimension_semantics=("parallel", "parallel"),
            vmem_limit_bytes=vmem_limit),
    )(x_r, w_g, b_col)

    # (N, C, H*W) -> NCHW is again a free reshape.
    return out_r.reshape(N, C_out, H, W)


# ---------------------------------------------------------------------------
# Pure-JAX reference
# ---------------------------------------------------------------------------
def prenorm_reference(x_nchw, g, w, b):
    eps = 1e-5 if x_nchw.dtype == jnp.float32 else 1e-3
    mean = jnp.mean(x_nchw, axis=1, keepdims=True)
    var = jnp.mean((x_nchw - mean) ** 2, axis=1, keepdims=True)
    normed = (x_nchw - mean) * jax.lax.rsqrt(var + eps) * g
    # 1x1 conv: out[n,o,h,w] = sum_c w[o,c] * normed[n,c,h,w] + b[o]
    out = jnp.einsum("oc,nchw->nohw", w, normed) + b[None, :, None, None]
    return out


if __name__ == "__main__":
    key = jax.random.PRNGKey(0)
    kx, kw, kb = jax.random.split(key, 3)

    N, C, H, W = 2, 4, 16, 16
    x = jax.random.normal(kx, (N, C, H, W), dtype=jnp.float32)

    # Parameters (deterministic in-script init).
    g = jnp.ones((1, C, 1, 1), dtype=jnp.float32)               # LayerNorm.g
    w = jax.random.normal(kw, (C, C), dtype=jnp.float32) * 0.1  # Conv2d 1x1 weight
    b = jax.random.normal(kb, (C,), dtype=jnp.float32) * 0.1    # Conv2d 1x1 bias

    out = prenorm_conv1x1(x, g, w, b)
    out = jax.block_until_ready(out)

    ref = prenorm_reference(x, g, w, b)
    assert out.shape == (N, C, H, W)
    # All-f32 compute inside the kernel: tight agreement with the reference.
    assert jnp.allclose(out, ref, atol=1e-3, rtol=1e-3), "mismatch vs reference"

    print("KERNEL_OK")
</pallas_src>

<mosaic_0001>
module attributes {stable_mosaic.version = 11 : i64} {
  func.func @prenorm_kernel(%arg0: i32, %arg1: i32, %arg2: memref<1x4x256xf32, #tpu.memory_space<vmem>>, %arg3: memref<4x4xf32, #tpu.memory_space<vmem>>, %arg4: memref<4x1xf32, #tpu.memory_space<vmem>>, %arg5: memref<1x4x256xf32, #tpu.memory_space<vmem>>) attributes {dimension_semantics = [#tpu.dimension_semantics<parallel>, #tpu.dimension_semantics<parallel>], iteration_bounds = array<i64: 2, 1>, scalar_prefetch = 0 : i64, scratch_operands = 0 : i64, tpu.core_type = #tpu.core_type<tc>, window_params = [{transform_indices = @transform_0, window_bounds = array<i64: 1, 4, 256>}, {pipeline_mode = #tpu.pipeline_mode<synchronous>, transform_indices = @transform_1, window_bounds = array<i64: 4, 4>}, {pipeline_mode = #tpu.pipeline_mode<synchronous>, transform_indices = @transform_2, window_bounds = array<i64: 4, 1>}, {transform_indices = @transform_3, window_bounds = array<i64: 1, 4, 256>}]} {
    %c0 = arith.constant 0 : index
    %c0_0 = arith.constant 0 : index
    %c0_1 = arith.constant 0 : index
    %0 = vector.load %arg2[%c0, %c0_0, %c0_1] : memref<1x4x256xf32, #tpu.memory_space<vmem>>, vector<1x4x256xf32>
    %1 = vector.shape_cast %0 : vector<1x4x256xf32> to vector<4x256xf32>
    %cst = arith.constant dense<0.000000e+00> : vector<256xf32>
    %2 = vector.multi_reduction <add>, %1, %cst [0] : vector<4x256xf32> to vector<256xf32>
    %3 = vector.shape_cast %2 : vector<256xf32> to vector<1x256xf32>
    %4 = arith.mulf %1, %1 : vector<4x256xf32>
    %cst_2 = arith.constant dense<0.000000e+00> : vector<256xf32>
    %5 = vector.multi_reduction <add>, %4, %cst_2 [0] : vector<4x256xf32> to vector<256xf32>
    %6 = vector.shape_cast %5 : vector<256xf32> to vector<1x256xf32>
    %cst_3 = arith.constant 2.500000e-01 : f32
    %7 = vector.broadcast %cst_3 : f32 to vector<1x256xf32>
    %8 = arith.mulf %3, %7 : vector<1x256xf32>
    %cst_4 = arith.constant 2.500000e-01 : f32
    %9 = vector.broadcast %cst_4 : f32 to vector<1x256xf32>
    %10 = arith.mulf %6, %9 : vector<1x256xf32>
    %11 = arith.mulf %8, %8 : vector<1x256xf32>
    %12 = arith.subf %10, %11 : vector<1x256xf32>
    %13 = vector.broadcast %8 : vector<1x256xf32> to vector<4x256xf32>
    %14 = arith.subf %1, %13 : vector<4x256xf32>
    %cst_5 = arith.constant 9.99999974E-6 : f32
    %15 = vector.broadcast %cst_5 : f32 to vector<1x256xf32>
    %16 = arith.addf %12, %15 : vector<1x256xf32>
    %17 = math.rsqrt %16 : vector<1x256xf32>
    %18 = vector.broadcast %17 : vector<1x256xf32> to vector<4x256xf32>
    %19 = arith.mulf %14, %18 : vector<4x256xf32>
    %c0_6 = arith.constant 0 : index
    %c0_7 = arith.constant 0 : index
    %20 = vector.load %arg3[%c0_6, %c0_7] : memref<4x4xf32, #tpu.memory_space<vmem>>, vector<4x4xf32>
    %c0_8 = arith.constant 0 : index
    %c0_9 = arith.constant 0 : index
    %21 = vector.load %arg4[%c0_8, %c0_9] : memref<4x1xf32, #tpu.memory_space<vmem>>, vector<4x1xf32>
    %cst_10 = arith.constant 0.000000e+00 : f32
    %22 = vector.broadcast %cst_10 : f32 to vector<1x256xf32>
    %23 = vector.broadcast %21 : vector<4x1xf32> to vector<4x256xf32>
    %24 = vector.broadcast %22 : vector<1x256xf32> to vector<4x256xf32>
    %25 = arith.addf %23, %24 : vector<4x256xf32>
    %26 = vector.extract_strided_slice %20 {offsets = [0, 0], sizes = [4, 1], strides = [1, 1]} : vector<4x4xf32> to vector<4x1xf32>
    %27 = vector.extract_strided_slice %19 {offsets = [0, 0], sizes = [1, 256], strides = [1, 1]} : vector<4x256xf32> to vector<1x256xf32>
    %28 = vector.broadcast %26 : vector<4x1xf32> to vector<4x256xf32>
    %29 = vector.broadcast %27 : vector<1x256xf32> to vector<4x256xf32>
    %30 = arith.mulf %28, %29 : vector<4x256xf32>
    %31 = arith.addf %25, %30 : vector<4x256xf32>
    %32 = vector.extract_strided_slice %20 {offsets = [0, 1], sizes = [4, 1], strides = [1, 1]} : vector<4x4xf32> to vector<4x1xf32>
    %33 = vector.extract_strided_slice %19 {offsets = [1, 0], sizes = [1, 256], strides = [1, 1]} : vector<4x256xf32> to vector<1x256xf32>
    %34 = vector.broadcast %32 : vector<4x1xf32> to vector<4x256xf32>
    %35 = vector.broadcast %33 : vector<1x256xf32> to vector<4x256xf32>
    %36 = arith.mulf %34, %35 : vector<4x256xf32>
    %37 = arith.addf %31, %36 : vector<4x256xf32>
    %38 = vector.extract_strided_slice %20 {offsets = [0, 2], sizes = [4, 1], strides = [1, 1]} : vector<4x4xf32> to vector<4x1xf32>
    %39 = vector.extract_strided_slice %19 {offsets = [2, 0], sizes = [1, 256], strides = [1, 1]} : vector<4x256xf32> to vector<1x256xf32>
    %40 = vector.broadcast %38 : vector<4x1xf32> to vector<4x256xf32>
    %41 = vector.broadcast %39 : vector<1x256xf32> to vector<4x256xf32>
    %42 = arith.mulf %40, %41 : vector<4x256xf32>
    %43 = arith.addf %37, %42 : vector<4x256xf32>
    %44 = vector.extract_strided_slice %20 {offsets = [0, 3], sizes = [4, 1], strides = [1, 1]} : vector<4x4xf32> to vector<4x1xf32>
    %45 = vector.extract_strided_slice %19 {offsets = [3, 0], sizes = [1, 256], strides = [1, 1]} : vector<4x256xf32> to vector<1x256xf32>
    %46 = vector.broadcast %44 : vector<4x1xf32> to vector<4x256xf32>
    %47 = vector.broadcast %45 : vector<1x256xf32> to vector<4x256xf32>
    %48 = arith.mulf %46, %47 : vector<4x256xf32>
    %49 = arith.addf %43, %48 : vector<4x256xf32>
    %c0_11 = arith.constant 0 : index
    %c0_12 = arith.constant 0 : index
    %c0_13 = arith.constant 0 : index
    %50 = vector.load %arg5[%c0_11, %c0_12, %c0_13] : memref<1x4x256xf32, #tpu.memory_space<vmem>>, vector<1x4x256xf32>
    %51 = vector.shape_cast %50 : vector<1x4x256xf32> to vector<4x256xf32>
    %52 = vector.shape_cast %49 : vector<4x256xf32> to vector<1x4x256xf32>
    tpu.vector_store %arg5[%c0_11, %c0_12, %c0_13], %52 {strides = array<i32>} : memref<1x4x256xf32, #tpu.memory_space<vmem>>, vector<1x4x256xf32>,
    return
  }
  func.func @transform_0(%arg0: i32, %arg1: i32) -> (i32, i32, i32) {
    %c0_i32 = arith.constant 0 : i32
    %c0_i32_0 = arith.constant 0 : i32
    return %arg0, %c0_i32, %arg1 : i32, i32, i32
  }
  func.func @transform_1(%arg0: i32, %arg1: i32) -> (i32, i32) {
    %c0_i32 = arith.constant 0 : i32
    %c0_i32_0 = arith.constant 0 : i32
    %c0_i32_1 = arith.constant 0 : i32
    return %c0_i32, %c0_i32_0 : i32, i32
  }
  func.func @transform_2(%arg0: i32, %arg1: i32) -> (i32, i32) {
    %c0_i32 = arith.constant 0 : i32
    %c0_i32_0 = arith.constant 0 : i32
    %c0_i32_1 = arith.constant 0 : i32
    return %c0_i32, %c0_i32_0 : i32, i32
  }
  func.func @transform_3(%arg0: i32, %arg1: i32) -> (i32, i32, i32) {
    %c0_i32 = arith.constant 0 : i32
    %c0_i32_0 = arith.constant 0 : i32
    return %arg0, %c0_i32, %arg1 : i32, i32, i32
  }
}

</mosaic_0001>

<bundles_post_ra>
// kernel: tpu_custom_call.1
= control target key start
LH: loop header
LB: loop body
LE: loop exit
PB: predicated region body
PF: predicated region fallthrough
CT: control target
= control target key end

     0   :  { %8 = vsyncpa [#allocation3], 0  ;;  %s858_s0 = inlined_call_operand.hbm [shape: f32[2,4,256], index: 0, kind: input, shape index: {}]   ;;  %s859_s1 = inlined_call_operand.vmem [shape: f32[4,4], index: 1, kind: input, shape index: {}]   ;;  %s860_s2 = inlined_call_operand.vmem [shape: f32[4,1], index: 2, kind: input, shape index: {}]   ;;  %s861_s3 = inlined_call_operand.hbm [shape: f32[2,4,256], index: 3, kind: output, shape index: {}]  }
   0x1   :  { %10 = vsyncpa [#allocation3 + $0x1], 0 }
   0x2   :  { %11 = vsyncpa [#allocation4], 0 }
   0x3   :  { %13 = vsyncpa [#allocation4 + $0x1], 0  ;;  %s714_s12 = smov 0   ;;  %s716_s13 = smov 0  }
   0x4   :  { %s718_s14 = smov 0   ;;  %s720_s15 = smov 0  }
   0x5   :  { %s722_s16 = smov 0   ;;  %s724_s17 = smov 0  }
   0x6 LB: > { %s486_s18 = sadd.s32 4294967295, %s686_s17   ;;  %s487_s19 = sadd.s32 4294967294, %s686_s17   ;;  %s686_s17 = sphi %s724_s17, %s19_s17   ;;  %s682_s16 = sphi %s722_s16, %s873_s16   ;;  %s678_s15 = sphi %s720_s15, %s872_s15   ;;  %s674_s14 = sphi %s718_s14, %s871_s14   ;;  %s670_s13 = sphi %s716_s13, %s870_s13   ;;  %s666_s12 = sphi %s714_s12, %s869_s12  }
   0x7   : > { %s31_s20 = sadd.s32 1, %s682_s16  ;;  %s40_s21 = sadd.s32 1, %s674_s14 }
   0x8   : > { %p33_p0 = scmp.ge.s32.totalorder %s31_s20, 2  ;;  %p47_p1 = scmp.ne.s32.totalorder %s674_s14, %s670_s13 }
   0x9   : > { %p48_p2 = scmp.eq.s32.totalorder %s686_s17, 0  ;;  %p53_p3 = scmp.ne.s32.totalorder %s670_s13, %s666_s12 }
   0xa   : > { %s875_s20 = smov (%p33_p0, %s31_s20), 0  ;;  %p54_p5 = scmp.eq.s32.totalorder %s486_s18, 0 }
   0xb   : > { %p755_p4 = por %p48_p2, %p47_p1  ;;  %s35_s23 = ssub.s32 %s682_s16, %s875_s20 }
   0xc   : > { %p121_p6 = scmp.eq.s32.totalorder %s486_s18, 1  ;;  %p38_p7 = scmp.eq.s32.totalorder %s35_s23, 0 }
   0xd   : > { %p761_p8 = por %p54_p5, %p53_p3  ;;  %p127_p10 = scmp.eq.s32.totalorder %s487_s19, 1 }
   0xe   : > { %p765_p9 = por %p121_p6, %p47_p1  ;;  %p515_p13 = scmp.lt.s32.totalorder %s686_s17, 2 }
   0xf   : > { %s770_s26 = scalar_select %p38_p7, %s674_s14, %s40_s21  }
  0x10   : > { %p772_p11 = por %p127_p10, %p53_p3  ;;  %s153_s28 = sand.u32 1, %s674_s14  }
  0x11   : > { %s490_s29 = sshll.u32 %s153_s28, 3  ;;  %s501_s30 = sshll.u32 %s682_s16, 7 }
  0x12   : > { %s865_s27 = scalar_select %p772_p11, 1, 0 }
  0x13   : > { %s165_s6 = scalar_lea.hbm %s858_s0, %s501_s30  ;;  %s157_s7 = scalar_lea.vmem [#allocation2], %s490_s29 }
  0x14   : > { %s167_s8 = sshll.u32 %s157_s7, 4  ;;  %p785_p0 = pnand %p515_p13, %p755_p4  ;;  %s168_s8 = int_to_ptr.vmem [resolvable:$true] %s167_s8 }
  0x15   : > { %p493_p1 = scmp.ge.s32.totalorder %s686_s17, 1  ;;  %p172_p2 = scmp.lt.s32.totalorder %s686_s17, 3 }
  0x16   : > { %s154_s10 = scalar_lea.sflag [#allocation3], %s153_s28  ;;  %p580_p3 = pneg %p785_p0 }
  0x17   : > { %s591_s11 = scalar_lea.vmem %s168_s8, 128  ;;  %s688_s18 = smov [#allocation2]  }
  0x18   : > { %p592_p5 = scmp.ne.s32.totalorder %s168_s8, %s591_s11  ;;  %s596_s19 = sshll.u32 %s688_s18, 4  ;;  %s597_s19 = int_to_ptr.vmem [resolvable:$false] %s596_s19 }
  0x19   : > { %s598_s21 = scalar_lea.vmem %s597_s19, 256  ;;  %p599_p10 = scmp.lt.s32.totalorder %s168_s8, %s597_s19 }
  0x1a   : > { %p594_p6 = pnand %p592_p5, %p580_p3  ;;  %p600_p12 = scmp.lt.s32.totalorder %s598_s21, %s591_s11 }
  0x1c   : > { %p595_p7 = pneg %p594_p6  ;;  %p601_p4 = por %p600_p12, %p599_p10 }
  0x1e   : > { %p602_p13 = pnand %p601_p4, %p595_p7 }
  0x20   : > { %605 = shalt.err (!%p602_p13)
}
  0x21   : > { %510 = dma.hbm_to_vmem [thread:$0]  (!%p785_p0), %s165_s6, 128, %s168_s8, %s154_s10  }
  0x22   : > { %p173_p11 = pnand %p493_p1, %p172_p2 }
  0x23   : > { %s800_s22 = sand.u32 (!%p173_p11), 1, %s670_s13  }
  0x24   : > { %176 = sbr.rel (%p173_p11) target bundleno = 196 (0xc4), region = 32  ;;  %s494_s23 = sshll.u32 (!%p173_p11), %s800_s22, 3 }
  0x25   : > { %s179_s28 = scalar_lea.sflag (!%p173_p11), [#allocation3], %s800_s22  ;;  %s182_s29 = scalar_lea.vmem (!%p173_p11), [#allocation2], %s494_s23 }
  0x29   : > { %657 = dma.done.wait (%p761_p8), %s179_s28, 128  }
  0x2a   : > { %659 = vsyncadd (%p761_p8), %s179_s28, 4294967168  ;;  %v689_v0 = vmov 0   ;;  %v690_v1 = vmov 1   ;;  %v266_v2 = vld [vmem:[%s859_s1] sm:$0xf]  ;;  %v691_v4 = vmov 2   ;;  %v280_v49 = vlaneseq }
  0x2b   : > { %569 = vset.pattern.permute.xlu0 %v689_v0  ;;  %570 = vset.pattern.permute.xlu1 %v690_v1  ;;  %v267_v3 = vld [vmem:[%s860_s2] sm:$0xf]  ;;  %v692_v5 = vmov 3   ;;  %vm211_vm0 = vcmask 1043456   ;;  %s502_s24 = sshll.u32 %s678_s15, 7  ;;  %s204_s7 = scalar_lea.vmem [#allocation5], %s494_s23 }
  0x2c   : > { %276 = vperm.xlu0 %569, %v266_v2   ;;  %303 = vperm.xlu1 %570, %v266_v2   ;;  %v207_v6 = vld [vmem:[%s182_s29] sm:$0xff]  ;;  %v281_v52 = vshrl.u32 %v280_v49, 7  ;;  %s402_s8 = sshll.u32 %s204_s7, 4  ;;  %s400_s11 = scalar_lea.hbm %s861_s3, %s502_s24  ;;  %s403_s8 = int_to_ptr.vmem [resolvable:$true] %s402_s8 }
  0x2d   : > { %v209_v7 = vcombine.high %v207_v6, %v207_v6  ;;  %v226_v8 = vmul.f32 %v207_v6, %v207_v6  ;;  %v212_v9 = vsel %vm211_vm0, %v207_v6, 0.0  ;;  %s386_s18 = scalar_lea.sflag [#allocation4], %s800_s22  ;;  %s606_s19 = scalar_lea.vmem %s403_s8, 128 }
  0x2e   : > { %v213_v12 = vrot.slane %v212_v9, 4  ;;  %v282_v55 = vsub.s32 0, %v281_v52  ;;  %v286_v56 = vsub.s32 4, %v281_v52  ;;  %v308_v58 = vsub.s32 1, %v281_v52  ;;  %p607_p8 = scmp.ne.s32.totalorder %s403_s8, %s606_s19  ;;  %s693_s21 = smov [#allocation5]  }
  0x2f   : > { %v228_v10 = vcombine.high %v226_v8, %v226_v8  ;;  %v219_v11 = vsel %vm211_vm0, %v209_v7, 0.0  ;;  %v230_v13 = vsel %vm211_vm0, %v226_v8, 0.0  ;;  %v312_v59 = vsub.s32 5, %v281_v52  ;;  %s610_s15 = sshll.u32 %s693_s21, 4  ;;  %s611_s15 = int_to_ptr.vmem [resolvable:$false] %s610_s15 }
  0x30   : > { %270 = vperm.xlu0 %569, %v267_v3   ;;  %571 = vset.pattern.permute.xlu1 %v691_v4  ;;  %v220_v14 = vrot.slane %v219_v11, 4  ;;  %v231_v16 = vrot.slane %v230_v13, 4  ;;  %v214_v17 = vadd.f32 %v213_v12, %v212_v9  ;;  %v334_v60 = vsub.s32 2, %v281_v52  ;;  %p608_p11 = pnand %p607_p8, %p765_p9  ;;  %s612_s23 = scalar_lea.vmem %s611_s15, 256 }
  0x31   : > { %329 = vperm.xlu1 %571, %v266_v2   ;;  %v237_v15 = vsel %vm211_vm0, %v228_v10, 0.0  ;;  %v338_v61 = vsub.s32 6, %v281_v52  ;;  %v360_v4 = vsub.s32 3, %v281_v52  ;;  %p613_p0 = scmp.lt.s32.totalorder %s403_s8, %s611_s15  ;;  %p614_p1 = scmp.lt.s32.totalorder %s612_s23, %s606_s19 }
  0x32   : > { %v238_v18 = vrot.slane %v237_v15, 4  ;;  %v221_v19 = vadd.f32 %v220_v14, %v219_v11  ;;  %v232_v20 = vadd.f32 %v231_v16, %v230_v13  ;;  %v215_v21 = vrot.slane %v214_v17, 2  ;;  %p609_p12 = pneg %p608_p11 }
  0x33   : > { %p615_p2 = por %p614_p1, %p613_p0 }
  0x34   : > { %572 = vset.pattern.permute.xlu0 %v692_v5  ;;  %v239_v22 = vadd.f32 %v238_v18, %v237_v15  ;;  %v222_v23 = vrot.slane %v221_v19, 2  ;;  %v233_v24 = vrot.slane %v232_v20, 2  ;;  %v216_v25 = vadd.f32 %v215_v21, %v214_v17 }
  0x35   : > { %355 = vperm.xlu0 %572, %v266_v2   ;;  %v364_v5 = vsub.s32 7, %v281_v52  ;;  %p616_p3 = pnand %p615_p2, %p609_p12 }
  0x36   : > { %v223_v26 = vadd.f32 %v222_v23, %v221_v19  ;;  %v240_v27 = vrot.slane %v239_v22, 2  ;;  %v217_v28 = vrot.slane %v216_v25, 1  ;;  %v234_v29 = vadd.f32 %v233_v24, %v232_v20 }
  0x38   : > { %v224_v30 = vrot.slane %v223_v26, 1  ;;  %v241_v31 = vadd.f32 %v240_v27, %v239_v22  ;;  %v218_v32 = vadd.f32 %v217_v28, %v216_v25  ;;  %v235_v33 = vrot.slane %v234_v29, 1 }
  0x3a   : > { %v225_v34 = vadd.f32 %v224_v30, %v223_v26  ;;  %v242_v35 = vrot.slane %v241_v31, 1  ;;  %v236_v36 = vadd.f32 %v235_v33, %v234_v29  ;;  %v244_v37 = vmul.f32 0.25, %v218_v32 }
  0x3c   : > { %v243_v38 = vadd.f32 %v242_v35, %v241_v31  ;;  %v245_v39 = vmul.f32 0.25, %v225_v34  ;;  %v246_v40 = vmul.f32 0.25, %v236_v36  ;;  %v248_v41 = vmul.f32 %v244_v37, %v244_v37 }
  0x3e   : > { %v247_v42 = vmul.f32 0.25, %v243_v38  ;;  %v249_v43 = vmul.f32 %v245_v39, %v245_v39  ;;  %v250_v44 = vsub.f32 %v246_v40, %v248_v41  ;;  %v254_v50 = vcombine.low %v244_v37, %v245_v39 }
  0x40   : > { %v251_v45 = vsub.f32 %v247_v42, %v249_v43  ;;  %v257_v46 = vadd.f32 1e-05, %v250_v44  ;;  %v256_v53 = vsub.f32 %v207_v6, %v254_v50 }
  0x42   : > { %v258_v47 = vadd.f32 1e-05, %v251_v45  ;;  %574 = vrsqrt.f32 %v257_v46 }
  0x44   : > { %576 = vrsqrt.f32 %v258_v47 }
  0x4f   : > { %v575_v48 = vpop.eup %574 }
  0x51   : > { %v577_v51 = vpop.eup %576 }
  0x52   : > { %v263_v54 = vcombine.low %v575_v48, %v577_v51 }
  0x54   : > { %v265_v57 = vmul.f32 %v263_v54, %v256_v53 }
  0x56   : > { %v283_v62 = vrot.slane %v265_v57, %v282_v55  ;;  %v287_v63 = vrot.slane %v265_v57, %v286_v56  ;;  %v309_v0 = vrot.slane %v265_v57, %v308_v58  ;;  %v313_v1 = vrot.slane %v265_v57, %v312_v59 }
  0x57   : > { %v335_v2 = vrot.slane %v265_v57, %v334_v60  ;;  %v339_v3 = vrot.slane %v265_v57, %v338_v61  ;;  %v361_v14 = vrot.slane %v265_v57, %v360_v4  ;;  %v365_v15 = vrot.slane %v265_v57, %v364_v5 }
  0x58   : > { %v293_v7 = vrot.slane %v283_v62, %v282_v55  ;;  %v297_v8 = vrot.slane %v287_v63, %v282_v55  ;;  %v319_v10 = vrot.slane %v309_v0, %v308_v58  ;;  %v323_v11 = vrot.slane %v313_v1, %v308_v58 }
  0x59   : > { %v345_v12 = vrot.slane %v335_v2, %v334_v60  ;;  %v349_v13 = vrot.slane %v339_v3, %v334_v60  ;;  %v371_v26 = vrot.slane %v361_v14, %v360_v4  ;;  %v375_v27 = vrot.slane %v365_v15, %v360_v4 }
  0xa7   : > { %v277_v9 = vpop.permute.xlu0 %276  ;;  %v304_v6 = vpop.permute.xlu1 %303 }
  0xa8   : > { %v298_v16 = vmul.f32 %v293_v7, %v277_v9  ;;  %v299_v17 = vmul.f32 %v297_v8, %v277_v9  ;;  %v324_v19 = vmul.f32 %v319_v10, %v304_v6  ;;  %v325_v20 = vmul.f32 %v323_v11, %v304_v6 }
  0xab   : > { %v271_v18 = vpop.permute.xlu0 %270 }
  0xac   : > { %v300_v21 = vadd.f32 %v298_v16, %v271_v18  ;;  %v301_v22 = vadd.f32 %v299_v17, %v271_v18  ;;  %v330_v23 = vpop.permute.xlu1 %329 }
  0xad   : > { %v350_v24 = vmul.f32 %v345_v12, %v330_v23  ;;  %v351_v25 = vmul.f32 %v349_v13, %v330_v23 }
  0xae   : > { %v326_v28 = vadd.f32 %v324_v19, %v300_v21  ;;  %v327_v29 = vadd.f32 %v325_v20, %v301_v22 }
  0xb0   : > { %v352_v30 = vadd.f32 %v350_v24, %v326_v28  ;;  %v353_v31 = vadd.f32 %v351_v25, %v327_v29  ;;  %v356_v32 = vpop.permute.xlu0 %355 }
  0xb1   : > { %v376_v33 = vmul.f32 %v371_v26, %v356_v32  ;;  %v377_v34 = vmul.f32 %v375_v27, %v356_v32 }
  0xb3   : > { %v378_v35 = vadd.f32 %v376_v33, %v352_v30  ;;  %v379_v36 = vadd.f32 %v377_v34, %v353_v31 }
  0xb5   : > { %v382_v37 = vcombine.low %v378_v35, %v379_v36 }
  0xb7   : > { %384 = vst [vmem:[%s204_s7] sm:$0xff] %v382_v37 }
  0xb8   : > { %619 = shalt.err (!%p616_p3)
}
  0xb9   : > { %s620_s28 = scalar_lea.hbm %s400_s11, 128  ;;  %s624_s30 = scalar_lea.hbm %s861_s3, 256 }
  0xba   : > { %p621_p5 = scmp.ne.s32.totalorder %s400_s11, %s620_s28  ;;  %p625_p10 = scmp.lt.s32.totalorder %s400_s11, %s861_s3 }
  0xbb   : > { %p626_p4 = scmp.lt.s32.totalorder %s624_s30, %s620_s28 }
  0xbc   : > { %p622_p6 = pnand %p621_p5, %p765_p9 }
  0xbd   : > { %p627_p13 = por %p626_p4, %p625_p10 }
  0xbe   : > { %p623_p7 = pneg %p622_p6 }
  0xc0   : > { %p628_p8 = pnand %p627_p13, %p623_p7 }
  0xc2   : > { %631 = shalt.err (!%p628_p8)
}
  0xc3   : > { %505 = dma.vmem_to_hbm [thread:$0]  (%p765_p9), %s403_s8, 128, %s400_s11, %s386_s18  }
  0xc4 PF: > { %s414_s6 = sand.u32 1, %s666_s12   ;;  %p867_p11 = scmp.ne.s32.totalorder %s865_s27, 0 }
  0xc5   : > { %p868_p12 = scmp.ge.s32.totalorder %s686_s17, 2  ;;  %s415_s24 = scalar_lea.sflag [#allocation4], %s414_s6 }
  0xc7   : > { %p512_p0 = pnand %p868_p12, %p867_p11 }
  0xc9   : > { %p513_p1 = pneg %p512_p0 }
  0xcb   : > { %661 = dma.done.wait (%p513_p1), %s415_s24, 128  }
  0xcc   : > { %663 = vsyncadd (%p513_p1), %s415_s24, 4294967168  ;;  %s19_s17 = sadd.s32 1, %s686_s17   ;;  %s869_s12 = smov %s670_s13 }
  0xcd   : > { %p16_p2 = scmp.ge.s32.totalorder %s19_s17, 4   ;;  %s870_s13 = smov %s674_s14 }
  0xce   : > { %s871_s14 = smov %s770_s26  ;;  %s872_s15 = smov %s682_s16 }
  0xcf   : > { %s873_s16 = smov %s875_s20  ;;  %18 = sbr.rel (!%p16_p2) target bundleno = 6 (0x6), region = 77 }
  0xd4   :  { %420 = vsyncpa [#allocation3], 1 }
  0xd5   :  { %422 = vsyncpa [#allocation3 + $0x1], 1 }
  0xd6   :  { %423 = vsyncpa [#allocation4], 1 }
  0xd7   :  { %425 = vsyncpa [#allocation4 + $0x1], 1 }

</bundles_post_ra>
